<compile_context>
chip_gen: v6e
topology: v6e:2x2x1
jax: 0.10.0
libtpu: 0.0.40
codegen_flags: <defaults>
</compile_context>

<pallas_src>
import functools

import jax
import jax.numpy as jnp
from jax import lax
from jax.experimental import pallas as pl
from jax.experimental.pallas import tpu as pltpu

LANE = 128               # lane width (last-dim tiling unit)
OUT_ROWS = 8             # transposed output slab height (one f32 sublane group)
MIN_MEGACORE_TILE = 256  # only force a 2-way split (v7x megacore) if halves >= this


def _round_up(x, m):
    return (x + m - 1) // m * m


# --------------------------------------------------------------------------
# Kernel: both Q heads in 3 MXU matmuls on packed / padded weights.
# --------------------------------------------------------------------------
def _qnet_kernel(s_ref, a_ref,
                 w1s_ref, w1a_ref, b1_ref,
                 w2_ref, b2_ref,
                 w3t_ref, b3t_ref,
                 out_ref):
    compute_dtype = w2_ref.dtype

    # Layer 1 (both heads; concat avoided by splitting W1 rows at num_inputs):
    #   h = relu(state @ W1_s + action @ W1_a + b1)            h: (tb, HP)
    h = (jnp.dot(s_ref[...], w1s_ref[...], preferred_element_type=jnp.float32)
         + jnp.dot(a_ref[...], w1a_ref[...], preferred_element_type=jnp.float32)
         + b1_ref[...])
    h = jnp.maximum(h, 0.0)

    # Layer 2 (block-diagonal packing of linear2 / linear5).
    # TODO(synk): for H >= 512 split this into two HxH matmuls; block-diagonal
    # packing wastes >50% of MXU FLOPs once the kernel is compute-bound.
    h = jnp.dot(h.astype(compute_dtype), w2_ref[...],
                preferred_element_type=jnp.float32) + b2_ref[...]
    h = jnp.maximum(h, 0.0)

    # Output layer, transposed:  qT = W3T @ h^T  -> (OUT_ROWS, tb)
    # (row 0 = q1, row 1 = q2).  Batch lives in the lane dimension, so the
    # store is lane-dense and tiny compared to a (tb, 128) padded slab.
    qT = lax.dot_general(
        w3t_ref[...], h.astype(compute_dtype),
        dimension_numbers=(((1,), (1,)), ((), ())),
        preferred_element_type=jnp.float32) + b3t_ref[...]
    out_ref[...] = qT.astype(out_ref.dtype)


# --------------------------------------------------------------------------
# Wrapper
# --------------------------------------------------------------------------
@functools.partial(jax.jit, static_argnames=("block_b",))
def qnetwork_forward(state, action, packed_params, *, block_b=512):
    """Equivalent of QNetwork.forward(state, action) -> (q1, q2).

    state:  [B, num_inputs]   float32
    action: [B, num_actions]  float32
    packed_params: output of pack_qnetwork_params(...)
    """
    (w1s, w1a, b1p, w2p, b2p, w3t, b3t) = packed_params
    B, num_inputs = state.shape
    num_actions = action.shape[1]
    HP = w2p.shape[0]

    compute_dtype = w1s.dtype
    state = state.astype(compute_dtype)
    action = action.astype(compute_dtype)

    # ---- batch tiling -----------------------------------------------------
    n_tiles = pl.cdiv(B, block_b)
    if n_tiles == 1 and B >= 2 * MIN_MEGACORE_TILE:
        n_tiles = 2                    # v7x megacore: keep both TensorCores busy
    if n_tiles == 1:
        # Single full-dim block: no batch padding needed at all.
        tb = b_pad = B
    else:
        # Near-equal tiles; the lane dim of the transposed output must be a
        # multiple of 128 when the block is not the full array extent.
        tb = _round_up(pl.cdiv(B, n_tiles), LANE)
        n_tiles = pl.cdiv(B, tb)
        b_pad = n_tiles * tb
    if b_pad != B:
        pad = b_pad - B
        state = jnp.pad(state, ((0, pad), (0, 0)))
        action = jnp.pad(action, ((0, pad), (0, 0)))

    grid = (n_tiles,)

    flops = 2 * b_pad * (num_inputs * HP + num_actions * HP
                         + HP * HP + HP * OUT_ROWS)
    weight_bytes = sum(int(p.size) * p.dtype.itemsize for p in packed_params)
    bytes_accessed = (
        state.size * state.dtype.itemsize
        + action.size * action.dtype.itemsize
        + weight_bytes
        + OUT_ROWS * b_pad * 4)

    # Scoped-VMEM budget: resident weights (double-buffered by default) plus
    # activations; raises v5e's 16 MiB default, capped at v7x's 64 MiB.
    act_tile_bytes = (4 * tb * (HP + OUT_ROWS)
                      + tb * (num_inputs + num_actions) * state.dtype.itemsize)
    vmem_limit = int(min(64 * 1024 * 1024,
                         max(32 * 1024 * 1024,
                             2 * weight_bytes + 8 * act_tile_bytes)))

    # Resident weights/biases: same block every grid step.
    # (For very large H on v7x, pipeline_mode=pl.Buffered(1) on these specs
    #  would halve their VMEM footprint; unnecessary at these sizes.)
    resident = lambda i: (0, 0)

    out = pl.pallas_call(
        _qnet_kernel,
        out_shape=jax.ShapeDtypeStruct((OUT_ROWS, b_pad), jnp.float32),
        grid_spec=pltpu.PrefetchScalarGridSpec(
            num_scalar_prefetch=0,
            grid=grid,
            in_specs=[
                pl.BlockSpec((tb, num_inputs), lambda i: (i, 0)),   # state
                pl.BlockSpec((tb, num_actions), lambda i: (i, 0)),  # action
                pl.BlockSpec(w1s.shape, resident),
                pl.BlockSpec(w1a.shape, resident),
                pl.BlockSpec(b1p.shape, resident),
                pl.BlockSpec(w2p.shape, resident),
                pl.BlockSpec(b2p.shape, resident),
                pl.BlockSpec(w3t.shape, resident),
                pl.BlockSpec(b3t.shape, resident),
            ],
            out_specs=pl.BlockSpec((OUT_ROWS, tb), lambda i: (0, i)),
        ),
        compiler_params=pltpu.CompilerParams(
            dimension_semantics=("parallel",),      # megacore on v7x
            vmem_limit_bytes=vmem_limit),
        cost_estimate=pl.CostEstimate(
            flops=int(flops), transcendentals=0,
            bytes_accessed=int(bytes_accessed)),
    )(state, action, w1s, w1a, b1p, w2p, b2p, w3t, b3t)

    q1 = out[0, :B][:, None]
    q2 = out[1, :B][:, None]
    return q1, q2


# --------------------------------------------------------------------------
# Parameter init (PyTorch-equivalent) and packing.
# --------------------------------------------------------------------------
def init_qnetwork_params(key, num_inputs, num_actions, hidden_dim):
    """Xavier-uniform weights (gain=1), zero biases.

    Weights stored as [in_features, out_features] (transposed vs nn.Linear).
    """
    in_dim = num_inputs + num_actions

    def xavier(k, fan_in, fan_out):
        bound = jnp.sqrt(6.0 / (fan_in + fan_out))
        return jax.random.uniform(k, (fan_in, fan_out), jnp.float32,
                                  minval=-bound, maxval=bound)

    keys = jax.random.split(key, 6)
    w1 = xavier(keys[0], in_dim, hidden_dim)
    w2 = xavier(keys[1], hidden_dim, hidden_dim)
    w3 = xavier(keys[2], hidden_dim, 1)
    w4 = xavier(keys[3], in_dim, hidden_dim)
    w5 = xavier(keys[4], hidden_dim, hidden_dim)
    w6 = xavier(keys[5], hidden_dim, 1)

    b1 = jnp.zeros((1, hidden_dim), jnp.float32)
    b2 = jnp.zeros((1, hidden_dim), jnp.float32)
    b3 = jnp.zeros((1, 1), jnp.float32)
    b4 = jnp.zeros((1, hidden_dim), jnp.float32)
    b5 = jnp.zeros((1, hidden_dim), jnp.float32)
    b6 = jnp.zeros((1, 1), jnp.float32)

    return (w1, b1, w2, b2, w3, b3, w4, b4, w5, b5, w6, b6)


def pack_qnetwork_params(params, num_inputs, compute_dtype=jnp.bfloat16):
    """Pack the 6 linear layers into fused, lane-aligned weights.

    Hidden-channel layout of the packed activations:
      [0, H)   head-1 hidden,   [H, 2H)  head-2 hidden,   [2H, HP)  zero pad,
    where HP = round_up(2H, 128).

    Matmul operands are cast to `compute_dtype` (bf16 default: native MXU
    dtype on v5e/v6e/v7x). Biases stay f32 since accumulation is f32. Pass
    jnp.float32 for a bit-tight reference check.
    """
    (w1, b1, w2, b2, w3, b3, w4, b4, w5, b5, w6, b6) = params
    in_dim, H = w1.shape
    num_actions = in_dim - num_inputs
    HP = _round_up(2 * H, LANE)

    def z(shape):
        return jnp.zeros(shape, jnp.float32)

    # Layer 1: rows split at num_inputs so the kernel never needs the concat.
    w1s = (z((num_inputs, HP))
           .at[:, :H].set(w1[:num_inputs])
           .at[:, H:2 * H].set(w4[:num_inputs]))
    w1a = (z((num_actions, HP))
           .at[:, :H].set(w1[num_inputs:])
           .at[:, H:2 * H].set(w4[num_inputs:]))
    b1p = z((1, HP)).at[:, :H].set(b1).at[:, H:2 * H].set(b4)

    # Layer 2: block-diagonal.
    w2p = z((HP, HP)).at[:H, :H].set(w2).at[H:2 * H, H:2 * H].set(w5)
    b2p = z((1, HP)).at[:, :H].set(b2).at[:, H:2 * H].set(b5)

    # Output layer, TRANSPOSED: (OUT_ROWS, HP); row 0 = linear3, row 1 = linear6.
    w3t = (z((OUT_ROWS, HP))
           .at[0, :H].set(w3[:, 0])
           .at[1, H:2 * H].set(w6[:, 0]))
    b3t = z((OUT_ROWS, 1)).at[0, 0].set(b3[0, 0]).at[1, 0].set(b6[0, 0])

    cd = compute_dtype
    return (w1s.astype(cd), w1a.astype(cd), b1p,
            w2p.astype(cd), b2p,
            w3t.astype(cd), b3t)


# --------------------------------------------------------------------------
# Pure-JAX reference (mirrors the PyTorch forward).
# --------------------------------------------------------------------------
def _reference_forward(state, action, params):
    (w1, b1, w2, b2, w3, b3, w4, b4, w5, b5, w6, b6) = params
    xu = jnp.concatenate([state, action], axis=1)
    x1 = jax.nn.relu(xu @ w1 + b1)
    x1 = jax.nn.relu(x1 @ w2 + b2)
    x1 = x1 @ w3 + b3
    x2 = jax.nn.relu(xu @ w4 + b4)
    x2 = jax.nn.relu(x2 @ w5 + b5)
    x2 = x2 @ w6 + b6
    return x1, x2


if __name__ == "__main__":
    batch = 8
    num_inputs = 12
    num_actions = 4
    hidden_dim = 32

    key = jax.random.PRNGKey(0)
    k_state, k_action, k_params = jax.random.split(key, 3)

    state = jax.random.normal(k_state, (batch, num_inputs), jnp.float32)
    action = jax.random.normal(k_action, (batch, num_actions), jnp.float32)
    params = init_qnetwork_params(k_params, num_inputs, num_actions, hidden_dim)

    r1, r2 = _reference_forward(state, action, params)

    # f32 matmul-operand path (bit-tight check against the reference).
    packed_f32 = pack_qnetwork_params(params, num_inputs, jnp.float32)
    q1, q2 = qnetwork_forward(state, action, packed_f32)
    q1 = jax.block_until_ready(q1)
    q2 = jax.block_until_ready(q2)
    assert q1.shape == (batch, 1) and q2.shape == (batch, 1)
    assert jnp.allclose(q1, r1, atol=1e-5, rtol=1e-5)
    assert jnp.allclose(q2, r2, atol=1e-5, rtol=1e-5)

    # Default bf16 matmul-operand path (native MXU dtype on v5e/v6e/v7x);
    # f32 accumulation/bias/ReLU -> looser tolerance.
    packed_bf16 = pack_qnetwork_params(params, num_inputs)
    q1b, q2b = qnetwork_forward(state, action, packed_bf16)
    q1b = jax.block_until_ready(q1b)
    q2b = jax.block_until_ready(q2b)
    assert q1b.shape == (batch, 1) and q2b.shape == (batch, 1)
    assert jnp.allclose(q1b, r1, atol=5e-2, rtol=5e-2)
    assert jnp.allclose(q2b, r2, atol=5e-2, rtol=5e-2)

    print("KERNEL_OK")
</pallas_src>

<mosaic_0001>
module attributes {stable_mosaic.version = 11 : i64} {
  func.func @_qnet_kernel(%arg0: i32, %arg1: memref<8x12xf32, #tpu.memory_space<vmem>>, %arg2: memref<8x4xf32, #tpu.memory_space<vmem>>, %arg3: memref<12x128xf32, #tpu.memory_space<vmem>>, %arg4: memref<4x128xf32, #tpu.memory_space<vmem>>, %arg5: memref<1x128xf32, #tpu.memory_space<vmem>>, %arg6: memref<128x128xf32, #tpu.memory_space<vmem>>, %arg7: memref<1x128xf32, #tpu.memory_space<vmem>>, %arg8: memref<8x128xf32, #tpu.memory_space<vmem>>, %arg9: memref<8x1xf32, #tpu.memory_space<vmem>>, %arg10: memref<8x8xf32, #tpu.memory_space<vmem>>) attributes {dimension_semantics = [#tpu.dimension_semantics<parallel>], iteration_bounds = array<i64: 1>, scalar_prefetch = 0 : i64, scratch_operands = 0 : i64, tpu.core_type = #tpu.core_type<tc>, window_params = [{transform_indices = @transform_0, window_bounds = array<i64: 8, 12>}, {transform_indices = @transform_1, window_bounds = array<i64: 8, 4>}, {pipeline_mode = #tpu.pipeline_mode<synchronous>, transform_indices = @transform_2, window_bounds = array<i64: 12, 128>}, {pipeline_mode = #tpu.pipeline_mode<synchronous>, transform_indices = @transform_3, window_bounds = array<i64: 4, 128>}, {pipeline_mode = #tpu.pipeline_mode<synchronous>, transform_indices = @transform_4, window_bounds = array<i64: 1, 128>}, {pipeline_mode = #tpu.pipeline_mode<synchronous>, transform_indices = @transform_5, window_bounds = array<i64: 128, 128>}, {pipeline_mode = #tpu.pipeline_mode<synchronous>, transform_indices = @transform_6, window_bounds = array<i64: 1, 128>}, {pipeline_mode = #tpu.pipeline_mode<synchronous>, transform_indices = @transform_7, window_bounds = array<i64: 8, 128>}, {pipeline_mode = #tpu.pipeline_mode<synchronous>, transform_indices = @transform_8, window_bounds = array<i64: 8, 1>}, {transform_indices = @transform_9, window_bounds = array<i64: 8, 8>}]} {
    %c0 = arith.constant 0 : index
    %c0_0 = arith.constant 0 : index
    %0 = vector.load %arg1[%c0, %c0_0] : memref<8x12xf32, #tpu.memory_space<vmem>>, vector<8x12xf32>
    %c0_1 = arith.constant 0 : index
    %c0_2 = arith.constant 0 : index
    %1 = vector.load %arg3[%c0_1, %c0_2] : memref<12x128xf32, #tpu.memory_space<vmem>>, vector<12x128xf32>
    %cst = arith.constant dense<0.000000e+00> : vector<8x128xf32>
    %2 = tpu.matmul %0, %1, %cst {dimension_numbers = #tpu.dot_dimension_numbers<[1], [0], [0], [1], [0, 0, 1, 1], [], []>} : vector<8x12xf32>, vector<12x128xf32>, vector<8x128xf32> -> vector<8x128xf32>
    %c0_3 = arith.constant 0 : index
    %c0_4 = arith.constant 0 : index
    %3 = vector.load %arg2[%c0_3, %c0_4] : memref<8x4xf32, #tpu.memory_space<vmem>>, vector<8x4xf32>
    %c0_5 = arith.constant 0 : index
    %c0_6 = arith.constant 0 : index
    %4 = vector.load %arg4[%c0_5, %c0_6] : memref<4x128xf32, #tpu.memory_space<vmem>>, vector<4x128xf32>
    %cst_7 = arith.constant dense<0.000000e+00> : vector<8x128xf32>
    %5 = tpu.matmul %3, %4, %cst_7 {dimension_numbers = #tpu.dot_dimension_numbers<[1], [0], [0], [1], [0, 0, 1, 1], [], []>} : vector<8x4xf32>, vector<4x128xf32>, vector<8x128xf32> -> vector<8x128xf32>
    %6 = arith.addf %2, %5 : vector<8x128xf32>
    %c0_8 = arith.constant 0 : index
    %c0_9 = arith.constant 0 : index
    %7 = vector.load %arg5[%c0_8, %c0_9] : memref<1x128xf32, #tpu.memory_space<vmem>>, vector<1x128xf32>
    %8 = vector.broadcast %7 : vector<1x128xf32> to vector<8x128xf32>
    %9 = arith.addf %6, %8 : vector<8x128xf32>
    %cst_10 = arith.constant 0.000000e+00 : f32
    %10 = vector.broadcast %cst_10 : f32 to vector<8x128xf32>
    %11 = arith.maximumf %9, %10 : vector<8x128xf32>
    %c0_11 = arith.constant 0 : index
    %c0_12 = arith.constant 0 : index
    %12 = vector.load %arg6[%c0_11, %c0_12] : memref<128x128xf32, #tpu.memory_space<vmem>>, vector<128x128xf32>
    %cst_13 = arith.constant dense<0.000000e+00> : vector<8x128xf32>
    %13 = tpu.matmul %11, %12, %cst_13 {dimension_numbers = #tpu.dot_dimension_numbers<[1], [0], [0], [1], [0, 0, 1, 1], [], []>} : vector<8x128xf32>, vector<128x128xf32>, vector<8x128xf32> -> vector<8x128xf32>
    %c0_14 = arith.constant 0 : index
    %c0_15 = arith.constant 0 : index
    %14 = vector.load %arg7[%c0_14, %c0_15] : memref<1x128xf32, #tpu.memory_space<vmem>>, vector<1x128xf32>
    %15 = vector.broadcast %14 : vector<1x128xf32> to vector<8x128xf32>
    %16 = arith.addf %13, %15 : vector<8x128xf32>
    %cst_16 = arith.constant 0.000000e+00 : f32
    %17 = vector.broadcast %cst_16 : f32 to vector<8x128xf32>
    %18 = arith.maximumf %16, %17 : vector<8x128xf32>
    %c0_17 = arith.constant 0 : index
    %c0_18 = arith.constant 0 : index
    %19 = vector.load %arg8[%c0_17, %c0_18] : memref<8x128xf32, #tpu.memory_space<vmem>>, vector<8x128xf32>
    %cst_19 = arith.constant dense<0.000000e+00> : vector<8x8xf32>
    %20 = tpu.matmul %19, %18, %cst_19 {dimension_numbers = #tpu.dot_dimension_numbers<[1], [1], [0], [0], [0, 0, 1, 0], [], []>} : vector<8x128xf32>, vector<8x128xf32>, vector<8x8xf32> -> vector<8x8xf32>
    %c0_20 = arith.constant 0 : index
    %c0_21 = arith.constant 0 : index
    %21 = vector.load %arg9[%c0_20, %c0_21] : memref<8x1xf32, #tpu.memory_space<vmem>>, vector<8x1xf32>
    %22 = vector.broadcast %21 : vector<8x1xf32> to vector<8x8xf32>
    %23 = arith.addf %20, %22 : vector<8x8xf32>
    %c0_22 = arith.constant 0 : index
    %c0_23 = arith.constant 0 : index
    %24 = vector.load %arg10[%c0_22, %c0_23] : memref<8x8xf32, #tpu.memory_space<vmem>>, vector<8x8xf32>
    tpu.vector_store %arg10[%c0_22, %c0_23], %23 {strides = array<i32>} : memref<8x8xf32, #tpu.memory_space<vmem>>, vector<8x8xf32>,
    return
  }
  func.func @transform_0(%arg0: i32) -> (i32, i32) {
    %c0_i32 = arith.constant 0 : i32
    %c0_i32_0 = arith.constant 0 : i32
    return %arg0, %c0_i32 : i32, i32
  }
  func.func @transform_1(%arg0: i32) -> (i32, i32) {
    %c0_i32 = arith.constant 0 : i32
    %c0_i32_0 = arith.constant 0 : i32
    return %arg0, %c0_i32 : i32, i32
  }
  func.func @transform_2(%arg0: i32) -> (i32, i32) {
    %c0_i32 = arith.constant 0 : i32
    %c0_i32_0 = arith.constant 0 : i32
    %c0_i32_1 = arith.constant 0 : i32
    return %c0_i32, %c0_i32_0 : i32, i32
  }
  func.func @transform_3(%arg0: i32) -> (i32, i32) {
    %c0_i32 = arith.constant 0 : i32
    %c0_i32_0 = arith.constant 0 : i32
    %c0_i32_1 = arith.constant 0 : i32
    return %c0_i32, %c0_i32_0 : i32, i32
  }
  func.func @transform_4(%arg0: i32) -> (i32, i32) {
    %c0_i32 = arith.constant 0 : i32
    %c0_i32_0 = arith.constant 0 : i32
    %c0_i32_1 = arith.constant 0 : i32
    return %c0_i32, %c0_i32_0 : i32, i32
  }
  func.func @transform_5(%arg0: i32) -> (i32, i32) {
    %c0_i32 = arith.constant 0 : i32
    %c0_i32_0 = arith.constant 0 : i32
    %c0_i32_1 = arith.constant 0 : i32
    return %c0_i32, %c0_i32_0 : i32, i32
  }
  func.func @transform_6(%arg0: i32) -> (i32, i32) {
    %c0_i32 = arith.constant 0 : i32
    %c0_i32_0 = arith.constant 0 : i32
    %c0_i32_1 = arith.constant 0 : i32
    return %c0_i32, %c0_i32_0 : i32, i32
  }
  func.func @transform_7(%arg0: i32) -> (i32, i32) {
    %c0_i32 = arith.constant 0 : i32
    %c0_i32_0 = arith.constant 0 : i32
    %c0_i32_1 = arith.constant 0 : i32
    return %c0_i32, %c0_i32_0 : i32, i32
  }
  func.func @transform_8(%arg0: i32) -> (i32, i32) {
    %c0_i32 = arith.constant 0 : i32
    %c0_i32_0 = arith.constant 0 : i32
    %c0_i32_1 = arith.constant 0 : i32
    return %c0_i32, %c0_i32_0 : i32, i32
  }
  func.func @transform_9(%arg0: i32) -> (i32, i32) {
    %c0_i32 = arith.constant 0 : i32
    %c0_i32_0 = arith.constant 0 : i32
    return %c0_i32, %arg0 : i32, i32
  }
}

</mosaic_0001>

<bundles_post_ra>
// kernel: qnetwork_forward.1
= control target key start
LH: loop header
LB: loop body
LE: loop exit
PB: predicated region body
PF: predicated region fallthrough
CT: control target
= control target key end

     0   :  { %14 = vsyncpa [#allocation3], 0  ;;  %s728_s0 = inlined_call_operand.vmem [shape: f32[8,12], index: 0, kind: input, shape index: {}]   ;;  %s729_s1 = inlined_call_operand.vmem [shape: f32[8,4], index: 1, kind: input, shape index: {}]   ;;  %s730_s2 = inlined_call_operand.vmem [shape: f32[12,128], index: 2, kind: input, shape index: {}]   ;;  %s731_s3 = inlined_call_operand.hbm [shape: f32[4,128], index: 3, kind: input, shape index: {}]   ;;  %s732_s4 = inlined_call_operand.hbm [shape: f32[1,128], index: 4, kind: input, shape index: {}]   ;;  %s733_s5 = inlined_call_operand.hbm [shape: f32[128,128], index: 5, kind: input, shape index: {}]   ;;  %s734_s6 = inlined_call_operand.hbm [shape: f32[1,128], index: 6, kind: input, shape index: {}]   ;;  %s735_s7 = inlined_call_operand.vmem [shape: f32[8,128], index: 7, kind: input, shape index: {}]   ;;  %s736_s8 = inlined_call_operand.vmem [shape: f32[8,1], index: 8, kind: input, shape index: {}]   ;;  %s737_s9 = inlined_call_operand.vmem [shape: f32[8,8], index: 9, kind: output, shape index: {}]  }
   0x1   :  { %15 = vsyncpa [#allocation5], 0 }
   0x2   :  { %16 = vsyncpa [#allocation8], 0  ;;  %s608_s30 = smov [#allocation4]   ;;  %s609_s11 = smov [#allocation2]  }
   0x3   :  { %s39_s10 = sshll.u32 %s608_s30, 4  ;;  %s29_s12 = sshll.u32 %s609_s11, 4  ;;  %s40_s10 = int_to_ptr.vmem [resolvable:$true] %s39_s10  ;;  %s30_s12 = int_to_ptr.vmem [resolvable:$true] %s29_s12 }
   0x4   :  { %s530_s13 = scalar_lea.vmem %s40_s10, 16  ;;  %s534_s14 = scalar_lea.vmem %s40_s10, 32 }
   0x5   :  { %p531_p0 = scmp.ne.s32.totalorder %s40_s10, %s530_s13  ;;  %p535_p1 = scmp.lt.s32.totalorder %s40_s10, %s40_s10 }
   0x6   :  { %p536_p2 = scmp.lt.s32.totalorder %s534_s14, %s530_s13 }
   0x8   :  { %p537_p3 = por %p536_p2, %p535_p1 }
   0xa   :  { %p538_p4 = pnand %p537_p3, %p531_p0 }
   0xc   :  { %541 = shalt.err (!%p538_p4)
}
   0xd   :  { %42 = dma.hbm_to_vmem [thread:$0]  %s732_s4, 16, %s40_s10, [#allocation5]  }
   0xe   :  { %s550_s17 = scalar_lea.vmem %s30_s12, 64  ;;  %p555_p6 = scmp.lt.s32.totalorder %s30_s12, %s30_s12 }
   0xf   :  { %p551_p5 = scmp.ne.s32.totalorder %s30_s12, %s550_s17  ;;  %p556_p7 = scmp.lt.s32.totalorder %s550_s17, %s550_s17 }
  0x11   :  { %p557_p8 = por %p556_p7, %p555_p6 }
  0x13   :  { %p558_p9 = pnand %p557_p8, %p551_p5 }
  0x15   :  { %561 = shalt.err (!%p558_p9)
}
  0x16   :  { %32 = dma.hbm_to_vmem [thread:$0]  %s731_s3, 64, %s30_s12, [#allocation3]  }
  0x17   :  { %s610_s20 = smov [#allocation6]  }
  0x18   :  { %s48_s21 = sshll.u32 %s610_s20, 4  ;;  %s49_s21 = int_to_ptr.vmem [resolvable:$true] %s48_s21 }
  0x19   :  { %s570_s22 = scalar_lea.vmem %s49_s21, 2048  ;;  %p575_p11 = scmp.lt.s32.totalorder %s49_s21, %s49_s21 }
  0x1a   :  { %p571_p10 = scmp.ne.s32.totalorder %s49_s21, %s570_s22  ;;  %p576_p12 = scmp.lt.s32.totalorder %s570_s22, %s570_s22 }
  0x1c   :  { %p577_p13 = por %p576_p12, %p575_p11 }
  0x1e   :  { %p578_p0 = pnand %p577_p13, %p571_p10 }
  0x20   :  { %581 = shalt.err (!%p578_p0)
}
  0x21   :  { %s611_s4 = smov 128   ;;  %s612_s23 = smov 8  }
  0x22   :  { %54 = dma.hbm_to_vmem [thread:$0]  %s733_s5, 2048, %s49_s21, [#allocation5], %s611_s4, %s611_s4, %s612_s23  }
  0x23   :  { %s613_s26 = smov [#allocation7]  }
  0x24   :  { %s61_s27 = sshll.u32 %s613_s26, 4  ;;  %s62_s27 = int_to_ptr.vmem [resolvable:$true] %s61_s27 }
  0x25   :  { %s590_s3 = scalar_lea.vmem %s62_s27, 16  ;;  %s594_s28 = scalar_lea.vmem %s62_s27, 32 }
  0x26   :  { %p591_p1 = scmp.ne.s32.totalorder %s62_s27, %s590_s3  ;;  %p595_p2 = scmp.lt.s32.totalorder %s62_s27, %s62_s27 }
  0x27   :  { %p596_p3 = scmp.lt.s32.totalorder %s594_s28, %s590_s3 }
  0x29   :  { %p597_p4 = por %p596_p3, %p595_p2 }
  0x2b   :  { %p598_p5 = pnand %p597_p4, %p591_p1 }
  0x2d   :  { %601 = shalt.err (!%p598_p5)
}
  0x2e   :  { %64 = dma.hbm_to_vmem [thread:$0]  %s734_s6, 16, %s62_s27, [#allocation8]  }
  0x2f   :  { %602 = dma.done.wait [#allocation3], 64  }
  0x30   :  { %603 = vsyncadd [#allocation3], 4294967232 }
  0x31   :  { %604 = dma.done.wait [#allocation5], 2064  }
  0x32   :  { %605 = vsyncadd [#allocation5], 4294965232 }
  0x33   :  { %606 = dma.done.wait [#allocation8], 16  }
  0x34   :  { %607 = vsyncadd [#allocation8], 4294967280  ;;  %v614_v0 = vmov 0.0   ;;  %vm615_vm0 = vmmov 0   ;;  %vm90_vm1 = vcmask 1043456   ;;  %vm86_vm2 = vcmask 31744  }
  0x35   :  { %460 = vmatprep.subr.mxu1 %v614_v0  ;;  %462 = vmatprep.mubr.msk.f32.mxu1 %vm615_vm0, %v614_v0  ;;  %v85_v1 = vld [vmem:[#allocation2] sm:$0xf]  ;;  %v83_v3 = vld [vmem:[%s730_s2 + $0x8] sm:$0xf]  ;;  %vm164_vm3 = vcmask 97280   ;;  %v264_v7 = vld [vmem:[#allocation6 + $0x70] sm:$0xff] }
  0x36   :  { %472 = vmatprep.subr.mxu0 %v614_v0  ;;  %504 = vmatprep.mubr.msk.f32.mxu0 %vm615_vm0, %v614_v0  ;;  %v84_v2 = vld [vmem:[%s729_s1] sm:$0xff]  ;;  %v263_v8 = vld [vmem:[#allocation6 + $0x68] sm:$0xff]  ;;  %v260_v11 = vld [vmem:[#allocation6 + $0x50] sm:$0xff]  ;;  %v616_v31 = vmov 0   ;;  %vm421_vm4 = vcmask 64512  }
  0x37   :  { %461 = vmatpush3.msk.msra.mxu1 %vm90_vm1, %v85_v1  ;;  %v265_v4 = vld [vmem:[#allocation6 + $0x78] sm:$0xff]  ;;  %v262_v9 = vld [vmem:[#allocation6 + $0x60] sm:$0xff]  ;;  %v259_v12 = vld [vmem:[#allocation6 + $0x48] sm:$0xff]  ;;  %521 = vset.pattern.permute.xlu0 %v616_v31 }
  0x38   :  { %463 = vmatmul.mubr.msk.f32.vlgmr.msra.gmra.mxu1 %vm86_vm2, %v84_v2  ;;  %465 = vmatprep.subr.mxu1 %v614_v0  ;;  %v82_v5 = vld [vmem:[%s730_s2] sm:$0xff]  ;;  %v256_v15 = vld [vmem:[#allocation6 + $0x30] sm:$0xff]  ;;  %v255_v16 = vld [vmem:[#allocation6 + $0x28] sm:$0xff] }
  0x39   :  { %466 = vmatpush3.msk.msra.mxu1 %vm90_vm1, %v83_v3  ;;  %469 = vmatprep.mubr.msk.f32.mxu1 %vm615_vm0, %v614_v0  ;;  %v81_v6 = vld [vmem:[%s728_s0] sm:$0xff]  ;;  %v252_v19 = vld [vmem:[#allocation6 + $0x10] sm:$0xff]  ;;  %v251_v20 = vld [vmem:[#allocation6 + $0x8] sm:$0xff] }
  0x3a   :  { %467 = vmatprep.subr.mxu1 %v614_v0  ;;  %473 = vmatpush3.msra.mxu0 %v265_v4  ;;  %v261_v10 = vld [vmem:[#allocation6 + $0x58] sm:$0xff]  ;;  %v258_v13 = vld [vmem:[#allocation6 + $0x40] sm:$0xff] }
  0x3b   :  { %468 = vmatpush3.msra.mxu1 %v82_v5  ;;  %474 = vmatprep.subr.mxu0 %v614_v0  ;;  %v257_v14 = vld [vmem:[#allocation6 + $0x38] sm:$0xff]  ;;  %v254_v17 = vld [vmem:[#allocation6 + $0x20] sm:$0xff] }
  0x3c   :  { %470 = vmatmul.mubr.msk.f32.vlgmr.msra.gmra.mxu1 %vm164_vm3, %v81_v6  ;;  %475 = vmatpush3.msra.mxu0 %v264_v7  ;;  %v253_v18 = vld [vmem:[#allocation6 + $0x18] sm:$0xff]  ;;  %v250_v21 = vld [vmem:[#allocation6] sm:$0xff] }
  0x3d   :  { %476 = vmatprep.subr.mxu0 %v614_v0  ;;  %507 = vmatprep.subr.mxu1 %v614_v0  ;;  %v434_v25 = vld [vmem:[#allocation4] ss:$0 sm:$0xff]  ;;  %v435_v32 = vld [vmem:[#allocation7] ss:$0 sm:$0xff] }
  0x3e   :  { %477 = vmatpush3.msra.mxu0 %v263_v8  ;;  %509 = vmatprep.mubr.msk.f32.mxu1 %vm615_vm0, %v614_v0  ;;  %v345_v30 = vld [vmem:[%s736_s8] sm:$0xff] }
  0x3f   :  { %478 = vmatprep.subr.mxu0 %v614_v0  ;;  %348 = vperm.xlu0 %521, %v345_v30   ;;  %v344_v37 = vld [vmem:[%s735_s7] sm:$0xff] }
  0x40   :  { %479 = vmatpush3.msra.mxu0 %v262_v9 }
  0x41   :  { %480 = vmatprep.subr.mxu0 %v614_v0 }
  0x42   :  { %481 = vmatpush3.msra.mxu0 %v261_v10 }
  0x43   :  { %482 = vmatprep.subr.mxu0 %v614_v0 }
  0x44   :  { %483 = vmatpush3.msra.mxu0 %v260_v11 }
  0x45   :  { %484 = vmatprep.subr.mxu0 %v614_v0 }
  0x46   :  { %485 = vmatpush3.msra.mxu0 %v259_v12 }
  0x47   :  { %486 = vmatprep.subr.mxu0 %v614_v0 }
  0x48   :  { %487 = vmatpush3.msra.mxu0 %v258_v13 }
  0x49   :  { %488 = vmatprep.subr.mxu0 %v614_v0 }
  0x4a   :  { %489 = vmatpush3.msra.mxu0 %v257_v14 }
  0x4b   :  { %490 = vmatprep.subr.mxu0 %v614_v0 }
  0x4c   :  { %491 = vmatpush3.msra.mxu0 %v256_v15 }
  0x4d   :  { %492 = vmatprep.subr.mxu0 %v614_v0 }
  0x4e   :  { %493 = vmatpush3.msra.mxu0 %v255_v16 }
  0x4f   :  { %494 = vmatprep.subr.mxu0 %v614_v0 }
  0x50   :  { %495 = vmatpush3.msra.mxu0 %v254_v17 }
  0x51   :  { %496 = vmatprep.subr.mxu0 %v614_v0 }
  0x52   :  { %497 = vmatpush3.msra.mxu0 %v253_v18 }
  0x53   :  { %498 = vmatprep.subr.mxu0 %v614_v0 }
  0x54   :  { %499 = vmatpush3.msra.mxu0 %v252_v19 }
  0x55   :  { %500 = vmatprep.subr.mxu0 %v614_v0 }
  0x56   :  { %501 = vmatpush3.msra.mxu0 %v251_v20 }
  0x57   :  { %502 = vmatprep.subr.mxu0 %v614_v0 }
  0x58   :  { %503 = vmatpush3.msra.mxu0 %v250_v21 }
  0xba   :  { %v349_v38 = vpop.permute.xlu0 %348 }
  0xf8   :  { %v160_v22 = vpop.f32.mrf.mxu1 }
  0xfa   :  { %v464_v23 = vpop.f32.mrf.mxu1 }
  0xfc   :  { %v237_v24 = vpop.f32.mrf.mxu1 }
  0xfd   :  { %v238_v26 = vadd.f32 %v237_v24, %v160_v22 }
  0xfe   :  { %v471_v27 = vpop.f32.mrf.mxu1 }
  0xff   :  { %v248_v28 = vadd.f32 %v434_v25, %v238_v26 }
 0x101   :  { %v249_v29 = vmax.f32 %v248_v28, 0.0 }
 0x103   :  { %505 = vmatmul.mubr.f32.vlgmr.msra.gmra.mxu0 %v249_v29 }
 0x1c3   :  { %v339_v33 = vpop.f32.mrf.mxu0 }
 0x1c4   :  { %v340_v34 = vadd.f32 %v435_v32, %v339_v33 }
 0x1c5   :  { %v506_v35 = vpop.f32.mrf.mxu0 }
 0x1c6   :  { %v343_v36 = vmax.f32 %v340_v34, 0.0 }
 0x1c8   :  { %508 = vmatpush3.xpose.msra.mxu1 %v343_v36 }
 0x1cb   :  { %510 = vmatmul.mubr.f32.vlgmr.msra.gmra.mxu1 %v344_v37 }
 0x28b   :  { %v417_v39 = vpop.f32.mrf.mxu1 }
 0x28c   :  { %v418_v40 = vadd.f32 %v417_v39, %v349_v38 }
 0x28d   :  { %v511_v41 = vpop.f32.mrf.mxu1 }
 0x28e   :  { %422 = vst.msk [vmem:[%s737_s9] sm:$0xff] %vm421_vm4, %v418_v40 }
 0x28f   :  { %427 = vsyncpa [#allocation3], 1 }
 0x290   :  { %428 = vsyncpa [#allocation5], 1 }
 0x291   :  { %429 = vsyncpa [#allocation8], 1 }

</bundles_post_ra>
